<compile_context>
chip_gen: v7x
topology: tpu7x:2x2x1
jax: 0.10.0
libtpu: 0.0.40
codegen_flags: <defaults>
</compile_context>

<pallas_src>
import functools

import jax
import jax.numpy as jnp
from jax.experimental import pallas as pl
from jax.experimental.pallas import tpu as pltpu

_TARGET_BLOCK_BYTES = 4 * 1024 * 1024    # VMEM-padded bytes per block
_VMEM_LIMIT_BYTES = 32 * 1024 * 1024     # safe on v5e/v6e (128 MiB) and v7x (64 MiB)
_ACTIVATIONS = ("ReLU", "Tanh", "Softplus")


def _round_up(a, b):
    return -(-a // b) * b


def _cdiv(a, b):
    return -(-a // b)


def _activation_kernel(x_ref, o_ref, *, activation, compute_dtype):
    x = x_ref[...].astype(compute_dtype)
    if activation == "ReLU":
        y = jnp.maximum(x, jnp.zeros((), dtype=compute_dtype))
    elif activation == "Tanh":
        y = jnp.tanh(x)
    elif activation == "Softplus":
        # PyTorch Softplus (beta=1, threshold=20): x if x > 20 else log1p(exp(x)).
        # exp/log1p run on the EUP; min/compare/where are free VPU filler.
        # TODO(synk): beta/threshold are hardcoded to nn.Softplus defaults.
        safe_x = jnp.minimum(x, 20.0)
        y = jnp.where(x > 20.0, x, jnp.log1p(jnp.exp(safe_x)))
    else:
        raise ValueError(f"unsupported activation: {activation}")
    o_ref[...] = y.astype(o_ref.dtype)


def _jnp_activation(x, activation):
    if activation == "ReLU":
        return jnp.maximum(x, jnp.zeros((), dtype=x.dtype))
    if activation == "Tanh":
        return jnp.tanh(x)
    if activation == "Softplus":
        return jnp.where(x > 20.0, x, jnp.log1p(jnp.exp(jnp.minimum(x, 20.0))))
    raise ValueError(f"unsupported activation: {activation}")


def activation_layer(x, activation="ReLU", *,
                     target_block_bytes=_TARGET_BLOCK_BYTES,
                     min_pallas_elems=16384,
                     donate_input=False):
    """ActivationLayer.forward: elementwise ReLU / Tanh / Softplus via Pallas."""
    if activation not in _ACTIVATIONS:
        raise ValueError(f"unsupported activation: {activation}")

    orig_shape = x.shape
    dtype = x.dtype
    n = x.size

    # Tiny / degenerate tensors: launch overhead dwarfs the work.
    if n == 0 or x.ndim == 0 or n < min_pallas_elems:
        return _jnp_activation(x, activation)

    # Collapse leading dims only: (d0,...,H,W) -> (L,H,W).  Layout-free on TPU
    # (tiling is on the last two dims), unlike a flatten-to-wide-lanes reshape.
    if x.ndim == 1:
        L, H, W = 1, 1, x.shape[0]
    else:
        H, W = x.shape[-2], x.shape[-1]
        L = n // (H * W)
    x3 = x.reshape(L, H, W)

    itemsize = jnp.dtype(dtype).itemsize
    sublane = {4: 8, 2: 16, 1: 32}.get(itemsize, 8)

    # VMEM footprint of one (1, H, W) slab after (sublane, 128) padding.
    slab_padded = _round_up(H, sublane) * _round_up(max(W, 1), 128) * itemsize
    total_padded = L * slab_padded

    # Minimum grid steps: keep the DMA/compute pipeline full and feed both
    # v7x TensorCores, without shredding small tensors into per-step overhead.
    if total_padded >= 2 * 1024 * 1024:
        desired_steps = 8
    elif total_padded >= 512 * 1024:
        desired_steps = 4
    elif total_padded >= 128 * 1024:
        desired_steps = 2
    else:
        desired_steps = 1

    # Chunk over the leading dim first (no alignment constraint there).
    bl = max(1, min(L, target_block_bytes // max(slab_padded, 1)))
    nl_wanted = min(desired_steps, L)
    bl = min(bl, max(1, L // nl_wanted))
    nl = _cdiv(L, bl)

    # Chunk the second-to-last dim only if one slab exceeds the block budget
    # or we are still short on pipeline steps.  bh is a sublane multiple (or
    # the full H), W is always the full last dim -> (8,128) rule satisfied;
    # Pallas masks any partial trailing block (no pad/slice in HBM).
    bh = H
    nh_needed = 1
    if slab_padded > target_block_bytes:
        nh_needed = _cdiv(slab_padded, target_block_bytes)
    if nl < desired_steps:
        nh_needed = max(nh_needed, _cdiv(desired_steps, nl))
    if nh_needed > 1 and H > sublane:
        bh = max(sublane, _round_up(_cdiv(H, nh_needed), sublane))
        if bh >= H:
            bh = H
    nh = _cdiv(H, bh)

    # Compute dtype: upcast half-precision floats for Tanh/Softplus (PyTorch
    # computes these internally at higher precision); ReLU is exact in-dtype.
    if activation != "ReLU" and jnp.issubdtype(dtype, jnp.floating) and itemsize < 4:
        compute_dtype = jnp.float32
    else:
        compute_dtype = dtype

    transcendentals = {"ReLU": 0, "Tanh": n, "Softplus": 2 * n}[activation]
    cost = pl.CostEstimate(
        flops=n,
        transcendentals=transcendentals,
        bytes_accessed=2 * n * itemsize,
    )

    kernel = functools.partial(_activation_kernel, activation=activation,
                               compute_dtype=compute_dtype)
    block = (bl, bh, W)

    extra_kwargs = {}
    if donate_input:
        extra_kwargs["input_output_aliases"] = {0: 0}

    y3 = pl.pallas_call(
        kernel,
        out_shape=jax.ShapeDtypeStruct((L, H, W), dtype),
        grid_spec=pltpu.PrefetchScalarGridSpec(
            num_scalar_prefetch=0,
            grid=(nl, nh),
            in_specs=[pl.BlockSpec(block, lambda i, j: (i, j, 0))],
            out_specs=pl.BlockSpec(block, lambda i, j: (i, j, 0)),
        ),
        compiler_params=pltpu.CompilerParams(
            # Independent blocks -> shards across both TCs on v7x.
            dimension_semantics=("parallel", "parallel"),
            vmem_limit_bytes=_VMEM_LIMIT_BYTES,
        ),
        cost_estimate=cost,
        **extra_kwargs,
    )(x3)

    # Inverse of the leading-dim collapse -> also layout-free.
    return y3.reshape(orig_shape)


if __name__ == "__main__":
    key = jax.random.PRNGKey(0)
    cases = [
        ((2, 4, 16, 16), jnp.float32),    # small NCHW, native-shape single block
        ((3, 5, 17, 9), jnp.float32),     # awkward dims -> masked partial blocks, no pad
        ((16, 64, 32, 32), jnp.float32),  # larger map -> 8-step parallel grid
        ((2, 4, 16, 16), jnp.bfloat16),   # bf16 path (Tanh/Softplus computed in f32)
    ]

    ok = True
    for shape, dtype in cases:
        key, sub = jax.random.split(key)
        x = (jax.random.normal(sub, shape, dtype=jnp.float32) * 3.0).astype(dtype)
        for act in ("ReLU", "Tanh", "Softplus"):
            # min_pallas_elems=0 forces the Pallas kernel path for the demo.
            y = activation_layer(x, act, min_pallas_elems=0)
            jax.block_until_ready(y)
            y_ref = _jnp_activation(x.astype(jnp.float32), act).astype(dtype)
            tol = 1e-5 if dtype == jnp.float32 else 2e-2
            good = (
                y.shape == x.shape
                and y.dtype == x.dtype
                and jnp.allclose(y.astype(jnp.float32), y_ref.astype(jnp.float32),
                                 atol=tol, rtol=tol)
            )
            if not good:
                ok = False
                print(f"MISMATCH for {act} at shape {shape} dtype {dtype}")

    if ok:
        print("KERNEL_OK")
</pallas_src>

<mosaic_0001>
module attributes {stable_mosaic.version = 11 : i64} {
  func.func @_activation_kernel(%arg0: i32, %arg1: i32, %arg2: memref<8x16x16xf32, #tpu.memory_space<vmem>>, %arg3: memref<8x16x16xf32, #tpu.memory_space<vmem>>) attributes {dimension_semantics = [#tpu.dimension_semantics<parallel>, #tpu.dimension_semantics<parallel>], iteration_bounds = array<i64: 1, 1>, scalar_prefetch = 0 : i64, scratch_operands = 0 : i64, tpu.core_type = #tpu.core_type<tc>, window_params = [{transform_indices = @transform_0, window_bounds = array<i64: 8, 16, 16>}, {transform_indices = @transform_1, window_bounds = array<i64: 8, 16, 16>}]} {
    %c0 = arith.constant 0 : index
    %c0_0 = arith.constant 0 : index
    %c0_1 = arith.constant 0 : index
    %0 = vector.load %arg2[%c0, %c0_0, %c0_1] : memref<8x16x16xf32, #tpu.memory_space<vmem>>, vector<8x16x16xf32>
    %cst = arith.constant 0.000000e+00 : f32
    %1 = vector.broadcast %cst : f32 to vector<8x16x16xf32>
    %2 = arith.maximumf %0, %1 : vector<8x16x16xf32>
    %c0_2 = arith.constant 0 : index
    %c0_3 = arith.constant 0 : index
    %c0_4 = arith.constant 0 : index
    %3 = vector.load %arg3[%c0_2, %c0_3, %c0_4] : memref<8x16x16xf32, #tpu.memory_space<vmem>>, vector<8x16x16xf32>
    tpu.vector_store %arg3[%c0_2, %c0_3, %c0_4], %2 {strides = array<i32>} : memref<8x16x16xf32, #tpu.memory_space<vmem>>, vector<8x16x16xf32>,
    return
  }
  func.func @transform_0(%arg0: i32, %arg1: i32) -> (i32, i32, i32) {
    %c0_i32 = arith.constant 0 : i32
    %c0_i32_0 = arith.constant 0 : i32
    return %arg0, %arg1, %c0_i32 : i32, i32, i32
  }
  func.func @transform_1(%arg0: i32, %arg1: i32) -> (i32, i32, i32) {
    %c0_i32 = arith.constant 0 : i32
    %c0_i32_0 = arith.constant 0 : i32
    return %arg0, %arg1, %c0_i32 : i32, i32, i32
  }
}

</mosaic_0001>

<bundles_post_ra>
// kernel: tpu_custom_call.1
= control target key start
LH: loop header
LB: loop body
LE: loop exit
PB: predicated region body
PF: predicated region fallthrough
CT: control target
= control target key end

     0   :  { %6 = vsyncpa [#allocation3], 0  ;;  %s204_s0 = inlined_call_operand.hbm [shape: f32[8,16,16], index: 0, kind: input, shape index: {}]   ;;  %s205_s1 = inlined_call_operand.hbm [shape: f32[8,16,16], index: 1, kind: output, shape index: {}]  }
   0x1   :  { %7 = vsyncpa [#allocation4], 0  ;;  %s141_s6 = smov [#allocation2]   ;;  %s93_s10 = scalar_lea.hbm %s204_s0, 2048 }
   0x2   :  { %s13_s7 = sshll.u32 %s141_s6, 4  ;;  %p94_p0 = scmp.ne.s32.totalorder %s204_s0, %s93_s10  ;;  %s14_s7 = int_to_ptr.vmem [resolvable:$true] %s13_s7 }
   0x3   :  { %p97_p1 = scmp.lt.u32.totalorder %s93_s10, %s204_s0 }
   0x5   :  { %p99_p2 = pnand %p97_p1, %p94_p0 }
   0x7   :  { %102 = shalt.err (!%p99_p2)
}
   0x8   :  { %s103_s15 = scalar_lea.vmem %s14_s7, 2048  ;;  %p108_p4 = scmp.lt.s32.totalorder %s14_s7, %s14_s7 }
   0x9   :  { %p104_p3 = scmp.ne.s32.totalorder %s14_s7, %s103_s15  ;;  %p109_p5 = scmp.lt.s32.totalorder %s103_s15, %s103_s15 }
   0xb   :  { %p110_p6 = por %p109_p5, %p108_p4 }
   0xd   :  { %p111_p7 = pnand %p110_p6, %p104_p3 }
   0xf   :  { %114 = shalt.err (!%p111_p7)
}
  0x10   :  { %s142_s16 = smov 128   ;;  %s143_s17 = smov 8  }
  0x11   :  { %19 = dma.hbm_to_vmem [thread:$0]  %s204_s0, 2048, %s14_s7, [#allocation3], %s142_s16, %s142_s16, %s143_s17  }
  0x12   :  { %137 = dma.done.wait [#allocation3], 2048  }
  0x13   :  { %138 = vsyncadd [#allocation3], 4294965248  ;;  %v23_v0 = vld [vmem:[#allocation2] sm:$0xff]  ;;  %vm55_vm0 = vcmask 130048   ;;  %v24_v1 = vld [vmem:[#allocation2 + $0x8] sm:$0xff]  ;;  %s144_s20 = smov [#allocation5]  }
  0x14   :  { %v25_v2 = vld [vmem:[#allocation2 + $0x10] sm:$0xff]  ;;  %s170_s21 = sshll.u32 %s144_s20, 4  ;;  %v39_v3 = vmax.f32 %v23_v0, 0.0  ;;  %v40_v4 = vmax.f32 %v24_v1, 0.0  ;;  %v26_v6 = vld [vmem:[#allocation2 + $0x18] sm:$0xff]  ;;  %v27_v7 = vld [vmem:[#allocation2 + $0x20] sm:$0xff]  ;;  %s78_s21 = int_to_ptr.vmem [resolvable:$true] %s170_s21 }
  0x15   :  { %v41_v5 = vmax.f32 %v25_v2, 0.0  ;;  %v28_v8 = vld [vmem:[#allocation2 + $0x28] sm:$0xff]  ;;  %v42_v9 = vmax.f32 %v26_v6, 0.0  ;;  %v43_v10 = vmax.f32 %v27_v7, 0.0  ;;  %v29_v12 = vld [vmem:[#allocation2 + $0x30] sm:$0xff]  ;;  %v30_v13 = vld [vmem:[#allocation2 + $0x38] sm:$0xff]  ;;  %p120_p9 = scmp.lt.s32.totalorder %s78_s21, %s78_s21 }
  0x16   :  { %v44_v11 = vmax.f32 %v28_v8, 0.0  ;;  %v31_v14 = vld [vmem:[#allocation2 + $0x40] sm:$0xff]  ;;  %56 = vst.msk [vmem:[#allocation5] sm:$0xff] %vm55_vm0, %v39_v3  ;;  %57 = vst.msk [vmem:[#allocation5 + $0x8] sm:$0xff] %vm55_vm0, %v40_v4  ;;  %v45_v15 = vmax.f32 %v29_v12, 0.0  ;;  %v46_v16 = vmax.f32 %v30_v13, 0.0 }
  0x17   :  { %58 = vst.msk [vmem:[#allocation5 + $0x10] sm:$0xff] %vm55_vm0, %v41_v5  ;;  %v47_v17 = vmax.f32 %v31_v14, 0.0  ;;  %v32_v18 = vld [vmem:[#allocation2 + $0x48] sm:$0xff]  ;;  %v33_v19 = vld [vmem:[#allocation2 + $0x50] sm:$0xff]  ;;  %v34_v20 = vld [vmem:[#allocation2 + $0x58] sm:$0xff]  ;;  %s115_s0 = scalar_lea.vmem %s78_s21, 2048 }
  0x18   :  { %59 = vst.msk [vmem:[#allocation5 + $0x18] sm:$0xff] %vm55_vm0, %v42_v9  ;;  %60 = vst.msk [vmem:[#allocation5 + $0x20] sm:$0xff] %vm55_vm0, %v43_v10  ;;  %v48_v21 = vmax.f32 %v32_v18, 0.0  ;;  %v49_v22 = vmax.f32 %v33_v19, 0.0  ;;  %v50_v23 = vmax.f32 %v34_v20, 0.0  ;;  %v35_v24 = vld [vmem:[#allocation2 + $0x60] sm:$0xff]  ;;  %p116_p8 = scmp.ne.s32.totalorder %s78_s21, %s115_s0  ;;  %p121_p10 = scmp.lt.s32.totalorder %s115_s0, %s115_s0 }
  0x19   :  { %61 = vst.msk [vmem:[#allocation5 + $0x28] sm:$0xff] %vm55_vm0, %v44_v11  ;;  %v36_v25 = vld [vmem:[#allocation2 + $0x68] sm:$0xff]  ;;  %v37_v26 = vld [vmem:[#allocation2 + $0x70] sm:$0xff]  ;;  %62 = vst.msk [vmem:[#allocation5 + $0x30] sm:$0xff] %vm55_vm0, %v45_v15  ;;  %v51_v27 = vmax.f32 %v35_v24, 0.0 }
  0x1a   :  { %63 = vst.msk [vmem:[#allocation5 + $0x38] sm:$0xff] %vm55_vm0, %v46_v16  ;;  %64 = vst.msk [vmem:[#allocation5 + $0x40] sm:$0xff] %vm55_vm0, %v47_v17  ;;  %v52_v28 = vmax.f32 %v36_v25, 0.0  ;;  %v53_v29 = vmax.f32 %v37_v26, 0.0  ;;  %v38_v30 = vld [vmem:[#allocation2 + $0x78] sm:$0xff]  ;;  %p122_p11 = por %p121_p10, %p120_p9 }
  0x1b   :  { %65 = vst.msk [vmem:[#allocation5 + $0x48] sm:$0xff] %vm55_vm0, %v48_v21  ;;  %66 = vst.msk [vmem:[#allocation5 + $0x50] sm:$0xff] %vm55_vm0, %v49_v22  ;;  %v54_v31 = vmax.f32 %v38_v30, 0.0 }
  0x1c   :  { %67 = vst.msk [vmem:[#allocation5 + $0x58] sm:$0xff] %vm55_vm0, %v50_v23  ;;  %68 = vst.msk [vmem:[#allocation5 + $0x60] sm:$0xff] %vm55_vm0, %v51_v27  ;;  %p123_p12 = pnand %p122_p11, %p116_p8 }
  0x1d   :  { %69 = vst.msk [vmem:[#allocation5 + $0x68] sm:$0xff] %vm55_vm0, %v52_v28  ;;  %70 = vst.msk [vmem:[#allocation5 + $0x70] sm:$0xff] %vm55_vm0, %v53_v29 }
  0x1e   :  { %71 = vst.msk [vmem:[#allocation5 + $0x78] sm:$0xff] %vm55_vm0, %v54_v31 }
  0x1f   :  { %126 = shalt.err (!%p123_p12)
}
  0x20   :  { %s127_s24 = scalar_lea.hbm %s205_s1, 2048 }
  0x21   :  { %p128_p13 = scmp.ne.s32.totalorder %s205_s1, %s127_s24  ;;  %p131_p0 = scmp.lt.u32.totalorder %s127_s24, %s205_s1 }
  0x23   :  { %p133_p1 = pnand %p131_p0, %p128_p13 }
  0x25   :  { %136 = shalt.err (!%p133_p1)
}
  0x26   :  { %83 = dma.vmem_to_hbm [thread:$0]  %s78_s21, 2048, %s205_s1, [#allocation4], %s142_s16, %s142_s16, %s143_s17  }
  0x27   :  { %139 = dma.done.wait [#allocation4], 2048  }
  0x28   :  { %140 = vsyncadd [#allocation4], 4294965248 }
  0x29   :  { %87 = vsyncpa [#allocation3], 1 }
  0x2a   :  { %88 = vsyncpa [#allocation4], 1 }

</bundles_post_ra>
